<compile_context>
chip_gen: v7x
topology: tpu7x:2x2x1
jax: 0.10.0
libtpu: 0.0.40
codegen_flags: <defaults>
</compile_context>

<pallas_src>
import functools

import jax
import jax.numpy as jnp
from jax.experimental import pallas as pl
from jax.experimental.pallas import tpu as pltpu

LANE = 128


def _round_up(x: int, m: int) -> int:
    return ((x + m - 1) // m) * m


def _chip_tile_config():
    """Generation-aware (batch_tile_cap, vmem_limit_bytes, is_v7x)."""
    kind = ""
    try:
        kind = jax.devices()[0].device_kind.lower()
    except Exception:
        pass
    is_v7 = ("v7" in kind) or ("7x" in kind)
    if is_v7:
        # v7x: only 64 MiB VMEM per TensorCore -> smaller tile, modest limit.
        return 32768, 48 * 1024 * 1024, True
    # v5e / v6e (128 MiB physical VMEM): big tiles, raised scoped limit.
    return 65536, 64 * 1024 * 1024, False


def _pick_tile(b_pad_lane: int, tb_cap: int, is_v7: bool) -> int:
    """Pick a lane-aligned batch tile: big enough to amortize per-step overhead,
    small enough for VMEM, >=2 steps on v7x, <=~10% padding waste."""
    tb = min(tb_cap, b_pad_lane)
    tb = max(LANE, (tb // LANE) * LANE)
    if is_v7 and b_pad_lane >= 2 * LANE:
        # Guarantee >=2 grid steps so both v7x TensorCores get work.
        tb = min(tb, max(LANE, (b_pad_lane // 2) // LANE * LANE))
    # Cap padding waste at ~10% of the lane-padded batch.
    while tb > LANE and _round_up(b_pad_lane, tb) * 10 > b_pad_lane * 11:
        tb = max(LANE, (tb // 2) // LANE * LANE)
    return tb


def dqn_kernel(x_ref,
               w1_ref, b1_ref,
               w2_ref, b2_ref,
               w3_ref, b3_ref,
               w4_ref, b4_ref,
               o_ref):
    # Feature-major: x tile (in_dim, TB) bf16; weights (out, in) bf16; biases (out, 1) f32.
    x = x_ref[...]                                                    # bf16 operands,
    h = jnp.dot(w1_ref[...], x, preferred_element_type=jnp.float32)  # f32 accumulation
    h = jnp.maximum(h + b1_ref[...], 0.0).astype(x.dtype)

    h = jnp.dot(w2_ref[...], h, preferred_element_type=jnp.float32)
    h = jnp.maximum(h + b2_ref[...], 0.0).astype(x.dtype)

    h = jnp.dot(w3_ref[...], h, preferred_element_type=jnp.float32)
    h = jnp.maximum(h + b3_ref[...], 0.0).astype(x.dtype)

    out = jnp.dot(w4_ref[...], h, preferred_element_type=jnp.float32) + b4_ref[...]
    o_ref[...] = out.astype(o_ref.dtype)


def _dqn_pallas(xt, weight_args, out_dim, tb, b_pad, vmem_limit, out_dtype):
    in_dim = xt.shape[0]
    grid = (b_pad // tb,)

    in_specs = [pl.BlockSpec((in_dim, tb), lambda i: (0, i))]          # streamed over batch
    for a in weight_args:                                               # VMEM-resident
        in_specs.append(pl.BlockSpec(a.shape, lambda i: (0, 0)))

    flops = 2 * b_pad * (in_dim * 16 + 16 * 32 + 32 * 16 + 16 * out_dim)
    bytes_accessed = (xt.size * xt.dtype.itemsize
                      + sum(a.size * a.dtype.itemsize for a in weight_args)
                      + b_pad * out_dim * jnp.dtype(out_dtype).itemsize)

    return pl.pallas_call(
        dqn_kernel,
        out_shape=jax.ShapeDtypeStruct((out_dim, b_pad), out_dtype),
        grid=grid,
        in_specs=in_specs,
        out_specs=pl.BlockSpec((out_dim, tb), lambda i: (0, i)),
        compiler_params=pltpu.CompilerParams(
            dimension_semantics=("parallel",),
            vmem_limit_bytes=vmem_limit,
        ),
        cost_estimate=pl.CostEstimate(
            flops=flops, transcendentals=0, bytes_accessed=bytes_accessed),
    )(xt, *weight_args)


@functools.partial(jax.jit, static_argnames=("transport_dtype",))
def dqn_forward_feature_major(xt, params, *, transport_dtype=jnp.bfloat16):
    """xt: (in_dim, B) feature-major activations. Returns (out_dim, B) in transport_dtype.

    This is the zero-extra-HBM-pass path for pipelines that keep activations
    feature-major end-to-end (no wrapper transpose / f32 round trips)."""
    in_dim, B = xt.shape
    out_dim = params["w4"].shape[0]

    tb_cap, vmem_limit, is_v7 = _chip_tile_config()
    b_pad_lane = _round_up(max(B, 1), LANE)
    tb = _pick_tile(b_pad_lane, tb_cap, is_v7)
    b_pad = _round_up(b_pad_lane, tb)

    xt = xt.astype(transport_dtype)
    if b_pad != B:
        xt = jnp.pad(xt, ((0, 0), (0, b_pad - B)))

    # Pre-cast weights to bf16 once (tiny); biases stay f32 and add into the f32 acc.
    weight_args = (params["w1"].astype(transport_dtype), params["b1"].astype(jnp.float32),
                   params["w2"].astype(transport_dtype), params["b2"].astype(jnp.float32),
                   params["w3"].astype(transport_dtype), params["b3"].astype(jnp.float32),
                   params["w4"].astype(transport_dtype), params["b4"].astype(jnp.float32))

    out_t = _dqn_pallas(xt, weight_args, out_dim, tb, b_pad, vmem_limit, transport_dtype)
    return out_t[:, :B]


def dqn_reference(x, params, transport_dtype=jnp.bfloat16):
    """Plain fused-XLA MLP with the same dtype choreography as the kernel.
    Used both as the small-batch bypass and as the correctness reference."""
    h = x.T.astype(transport_dtype)                                   # (in_dim, B)
    for i in range(1, 4):
        h = jnp.dot(params[f"w{i}"].astype(transport_dtype), h,
                    preferred_element_type=jnp.float32) + params[f"b{i}"]
        h = jnp.maximum(h, 0.0).astype(transport_dtype)
    out = jnp.dot(params["w4"].astype(transport_dtype), h,
                  preferred_element_type=jnp.float32) + params["b4"]
    return out.astype(transport_dtype).T.astype(jnp.float32)         # (B, out_dim)


@functools.partial(jax.jit, static_argnames=("min_kernel_batch", "transport_dtype"))
def dqn_forward(x, params, *, min_kernel_batch: int = 4096,
                transport_dtype=jnp.bfloat16):
    """x: (B, input_dim) float32 (torch-style batch-major). Returns (B, output_dim) float32."""
    B = x.shape[0]
    if B < min_kernel_batch:
        # Small-batch bypass: kernel launch + 128-lane padding dwarf the math.
        return dqn_reference(x, params, transport_dtype)
    out_t = dqn_forward_feature_major(x.T, params, transport_dtype=transport_dtype)
    return out_t.T.astype(jnp.float32)


def init_dqn_params(key, input_dim, output_dim):
    """Deterministic init mimicking PyTorch Linear default (uniform +/- 1/sqrt(fan_in)).

    Weights in PyTorch layout (out_features, in_features); biases as (out_features, 1)."""
    dims = [input_dim, 16, 32, 16, output_dim]
    params = {}
    for i in range(4):
        fan_in, fan_out = dims[i], dims[i + 1]
        key, kw, kb = jax.random.split(key, 3)
        bound = 1.0 / jnp.sqrt(fan_in)
        params[f"w{i+1}"] = jax.random.uniform(
            kw, (fan_out, fan_in), jnp.float32, -bound, bound)
        params[f"b{i+1}"] = jax.random.uniform(
            kb, (fan_out, 1), jnp.float32, -bound, bound)
    return params


if __name__ == "__main__":
    key = jax.random.PRNGKey(0)
    kx, kx2, kp = jax.random.split(key, 3)

    input_dim = 4      # DQN(input_dim=(4,), ...)
    output_dim = 2     # DQN(..., output_dim=2, ...)
    params = init_dqn_params(kp, input_dim, output_dim)

    # Small batch (torch-style shape), forcing the Pallas path so the kernel is exercised.
    x = jax.random.normal(kx, (2, input_dim), dtype=jnp.float32)
    out = dqn_forward(x, params, min_kernel_batch=0)
    out = jax.block_until_ready(out)
    ref = dqn_reference(x, params)
    assert out.shape == (2, output_dim)
    assert jnp.allclose(out, ref, atol=1e-2, rtol=1e-2), "mismatch vs reference (B=2)"

    # Non-lane-aligned batch to exercise padding / slicing in the kernel path.
    x2 = jax.random.normal(kx2, (300, input_dim), dtype=jnp.float32)
    out2 = dqn_forward(x2, params, min_kernel_batch=0)
    out2 = jax.block_until_ready(out2)
    ref2 = dqn_reference(x2, params)
    assert out2.shape == (300, output_dim)
    assert jnp.allclose(out2, ref2, atol=1e-2, rtol=1e-2), "mismatch vs reference (B=300)"

    print("KERNEL_OK")
</pallas_src>

<mosaic_0001>
module attributes {stable_mosaic.version = 11 : i64} {
  func.func @dqn_kernel(%arg0: i32, %arg1: memref<4x128xbf16, #tpu.memory_space<vmem>>, %arg2: memref<16x4xbf16, #tpu.memory_space<vmem>>, %arg3: memref<16x1xf32, #tpu.memory_space<vmem>>, %arg4: memref<32x16xbf16, #tpu.memory_space<vmem>>, %arg5: memref<32x1xf32, #tpu.memory_space<vmem>>, %arg6: memref<16x32xbf16, #tpu.memory_space<vmem>>, %arg7: memref<16x1xf32, #tpu.memory_space<vmem>>, %arg8: memref<2x16xbf16, #tpu.memory_space<vmem>>, %arg9: memref<2x1xf32, #tpu.memory_space<vmem>>, %arg10: memref<2x128xbf16, #tpu.memory_space<vmem>>) attributes {dimension_semantics = [#tpu.dimension_semantics<parallel>], iteration_bounds = array<i64: 1>, scalar_prefetch = 0 : i64, scratch_operands = 0 : i64, tpu.core_type = #tpu.core_type<tc>, window_params = [{transform_indices = @transform_0, window_bounds = array<i64: 4, 128>}, {pipeline_mode = #tpu.pipeline_mode<synchronous>, transform_indices = @transform_1, window_bounds = array<i64: 16, 4>}, {pipeline_mode = #tpu.pipeline_mode<synchronous>, transform_indices = @transform_2, window_bounds = array<i64: 16, 1>}, {pipeline_mode = #tpu.pipeline_mode<synchronous>, transform_indices = @transform_3, window_bounds = array<i64: 32, 16>}, {pipeline_mode = #tpu.pipeline_mode<synchronous>, transform_indices = @transform_4, window_bounds = array<i64: 32, 1>}, {pipeline_mode = #tpu.pipeline_mode<synchronous>, transform_indices = @transform_5, window_bounds = array<i64: 16, 32>}, {pipeline_mode = #tpu.pipeline_mode<synchronous>, transform_indices = @transform_6, window_bounds = array<i64: 16, 1>}, {pipeline_mode = #tpu.pipeline_mode<synchronous>, transform_indices = @transform_7, window_bounds = array<i64: 2, 16>}, {pipeline_mode = #tpu.pipeline_mode<synchronous>, transform_indices = @transform_8, window_bounds = array<i64: 2, 1>}, {transform_indices = @transform_9, window_bounds = array<i64: 2, 128>}]} {
    %c0 = arith.constant 0 : index
    %c0_0 = arith.constant 0 : index
    %0 = vector.load %arg1[%c0, %c0_0] : memref<4x128xbf16, #tpu.memory_space<vmem>>, vector<4x128xbf16>
    %c0_1 = arith.constant 0 : index
    %c0_2 = arith.constant 0 : index
    %1 = vector.load %arg2[%c0_1, %c0_2] : memref<16x4xbf16, #tpu.memory_space<vmem>>, vector<16x4xbf16>
    %cst = arith.constant dense<0.000000e+00> : vector<16x128xf32>
    %2 = tpu.matmul %1, %0, %cst {dimension_numbers = #tpu.dot_dimension_numbers<[1], [0], [0], [1], [0, 0, 1, 1], [], []>} : vector<16x4xbf16>, vector<4x128xbf16>, vector<16x128xf32> -> vector<16x128xf32>
    %c0_3 = arith.constant 0 : index
    %c0_4 = arith.constant 0 : index
    %3 = vector.load %arg3[%c0_3, %c0_4] : memref<16x1xf32, #tpu.memory_space<vmem>>, vector<16x1xf32>
    %4 = vector.broadcast %3 : vector<16x1xf32> to vector<16x128xf32>
    %5 = arith.addf %2, %4 : vector<16x128xf32>
    %cst_5 = arith.constant 0.000000e+00 : f32
    %6 = vector.broadcast %cst_5 : f32 to vector<16x128xf32>
    %7 = arith.maximumf %5, %6 : vector<16x128xf32>
    %8 = arith.truncf %7 : vector<16x128xf32> to vector<16x128xbf16>
    %c0_6 = arith.constant 0 : index
    %c0_7 = arith.constant 0 : index
    %9 = vector.load %arg4[%c0_6, %c0_7] : memref<32x16xbf16, #tpu.memory_space<vmem>>, vector<32x16xbf16>
    %cst_8 = arith.constant dense<0.000000e+00> : vector<32x128xf32>
    %10 = tpu.matmul %9, %8, %cst_8 {dimension_numbers = #tpu.dot_dimension_numbers<[1], [0], [0], [1], [0, 0, 1, 1], [], []>} : vector<32x16xbf16>, vector<16x128xbf16>, vector<32x128xf32> -> vector<32x128xf32>
    %c0_9 = arith.constant 0 : index
    %c0_10 = arith.constant 0 : index
    %11 = vector.load %arg5[%c0_9, %c0_10] : memref<32x1xf32, #tpu.memory_space<vmem>>, vector<32x1xf32>
    %12 = vector.broadcast %11 : vector<32x1xf32> to vector<32x128xf32>
    %13 = arith.addf %10, %12 : vector<32x128xf32>
    %cst_11 = arith.constant 0.000000e+00 : f32
    %14 = vector.broadcast %cst_11 : f32 to vector<32x128xf32>
    %15 = arith.maximumf %13, %14 : vector<32x128xf32>
    %16 = arith.truncf %15 : vector<32x128xf32> to vector<32x128xbf16>
    %c0_12 = arith.constant 0 : index
    %c0_13 = arith.constant 0 : index
    %17 = vector.load %arg6[%c0_12, %c0_13] : memref<16x32xbf16, #tpu.memory_space<vmem>>, vector<16x32xbf16>
    %cst_14 = arith.constant dense<0.000000e+00> : vector<16x128xf32>
    %18 = tpu.matmul %17, %16, %cst_14 {dimension_numbers = #tpu.dot_dimension_numbers<[1], [0], [0], [1], [0, 0, 1, 1], [], []>} : vector<16x32xbf16>, vector<32x128xbf16>, vector<16x128xf32> -> vector<16x128xf32>
    %c0_15 = arith.constant 0 : index
    %c0_16 = arith.constant 0 : index
    %19 = vector.load %arg7[%c0_15, %c0_16] : memref<16x1xf32, #tpu.memory_space<vmem>>, vector<16x1xf32>
    %20 = vector.broadcast %19 : vector<16x1xf32> to vector<16x128xf32>
    %21 = arith.addf %18, %20 : vector<16x128xf32>
    %cst_17 = arith.constant 0.000000e+00 : f32
    %22 = vector.broadcast %cst_17 : f32 to vector<16x128xf32>
    %23 = arith.maximumf %21, %22 : vector<16x128xf32>
    %24 = arith.truncf %23 : vector<16x128xf32> to vector<16x128xbf16>
    %c0_18 = arith.constant 0 : index
    %c0_19 = arith.constant 0 : index
    %25 = vector.load %arg8[%c0_18, %c0_19] : memref<2x16xbf16, #tpu.memory_space<vmem>>, vector<2x16xbf16>
    %cst_20 = arith.constant dense<0.000000e+00> : vector<2x128xf32>
    %26 = tpu.matmul %25, %24, %cst_20 {dimension_numbers = #tpu.dot_dimension_numbers<[1], [0], [0], [1], [0, 0, 1, 1], [], []>} : vector<2x16xbf16>, vector<16x128xbf16>, vector<2x128xf32> -> vector<2x128xf32>
    %c0_21 = arith.constant 0 : index
    %c0_22 = arith.constant 0 : index
    %27 = vector.load %arg9[%c0_21, %c0_22] : memref<2x1xf32, #tpu.memory_space<vmem>>, vector<2x1xf32>
    %28 = vector.broadcast %27 : vector<2x1xf32> to vector<2x128xf32>
    %29 = arith.addf %26, %28 : vector<2x128xf32>
    %30 = arith.truncf %29 : vector<2x128xf32> to vector<2x128xbf16>
    %c0_23 = arith.constant 0 : index
    %c0_24 = arith.constant 0 : index
    %31 = vector.load %arg10[%c0_23, %c0_24] : memref<2x128xbf16, #tpu.memory_space<vmem>>, vector<2x128xbf16>
    tpu.vector_store %arg10[%c0_23, %c0_24], %30 {strides = array<i32>} : memref<2x128xbf16, #tpu.memory_space<vmem>>, vector<2x128xbf16>,
    return
  }
  func.func @transform_0(%arg0: i32) -> (i32, i32) {
    %c0_i32 = arith.constant 0 : i32
    %c0_i32_0 = arith.constant 0 : i32
    return %c0_i32, %arg0 : i32, i32
  }
  func.func @transform_1(%arg0: i32) -> (i32, i32) {
    %c0_i32 = arith.constant 0 : i32
    %c0_i32_0 = arith.constant 0 : i32
    %c0_i32_1 = arith.constant 0 : i32
    return %c0_i32, %c0_i32_0 : i32, i32
  }
  func.func @transform_2(%arg0: i32) -> (i32, i32) {
    %c0_i32 = arith.constant 0 : i32
    %c0_i32_0 = arith.constant 0 : i32
    %c0_i32_1 = arith.constant 0 : i32
    return %c0_i32, %c0_i32_0 : i32, i32
  }
  func.func @transform_3(%arg0: i32) -> (i32, i32) {
    %c0_i32 = arith.constant 0 : i32
    %c0_i32_0 = arith.constant 0 : i32
    %c0_i32_1 = arith.constant 0 : i32
    return %c0_i32, %c0_i32_0 : i32, i32
  }
  func.func @transform_4(%arg0: i32) -> (i32, i32) {
    %c0_i32 = arith.constant 0 : i32
    %c0_i32_0 = arith.constant 0 : i32
    %c0_i32_1 = arith.constant 0 : i32
    return %c0_i32, %c0_i32_0 : i32, i32
  }
  func.func @transform_5(%arg0: i32) -> (i32, i32) {
    %c0_i32 = arith.constant 0 : i32
    %c0_i32_0 = arith.constant 0 : i32
    %c0_i32_1 = arith.constant 0 : i32
    return %c0_i32, %c0_i32_0 : i32, i32
  }
  func.func @transform_6(%arg0: i32) -> (i32, i32) {
    %c0_i32 = arith.constant 0 : i32
    %c0_i32_0 = arith.constant 0 : i32
    %c0_i32_1 = arith.constant 0 : i32
    return %c0_i32, %c0_i32_0 : i32, i32
  }
  func.func @transform_7(%arg0: i32) -> (i32, i32) {
    %c0_i32 = arith.constant 0 : i32
    %c0_i32_0 = arith.constant 0 : i32
    %c0_i32_1 = arith.constant 0 : i32
    return %c0_i32, %c0_i32_0 : i32, i32
  }
  func.func @transform_8(%arg0: i32) -> (i32, i32) {
    %c0_i32 = arith.constant 0 : i32
    %c0_i32_0 = arith.constant 0 : i32
    %c0_i32_1 = arith.constant 0 : i32
    return %c0_i32, %c0_i32_0 : i32, i32
  }
  func.func @transform_9(%arg0: i32) -> (i32, i32) {
    %c0_i32 = arith.constant 0 : i32
    %c0_i32_0 = arith.constant 0 : i32
    return %c0_i32, %arg0 : i32, i32
  }
}

</mosaic_0001>

<bundles_post_ra>
// kernel: dqn_forward_feature_major.1
= control target key start
LH: loop header
LB: loop body
LE: loop exit
PB: predicated region body
PF: predicated region fallthrough
CT: control target
= control target key end

     0   :  { %14 = vsyncpa [#allocation3], 0  ;;  %s985_s0 = inlined_call_operand.hbm [shape: bf16[4,128], index: 0, kind: input, shape index: {}]   ;;  %s986_s1 = inlined_call_operand.hbm [shape: bf16[16,4], index: 1, kind: input, shape index: {}]   ;;  %s987_s2 = inlined_call_operand.hbm [shape: f32[16,1], index: 2, kind: input, shape index: {}]   ;;  %s988_s3 = inlined_call_operand.hbm [shape: bf16[32,16], index: 3, kind: input, shape index: {}]   ;;  %s989_s4 = inlined_call_operand.hbm [shape: f32[32,1], index: 4, kind: input, shape index: {}]   ;;  %s990_s5 = inlined_call_operand.hbm [shape: bf16[16,32], index: 5, kind: input, shape index: {}]   ;;  %s991_s6 = inlined_call_operand.hbm [shape: f32[16,1], index: 6, kind: input, shape index: {}]   ;;  %s992_s7 = inlined_call_operand.hbm [shape: bf16[2,16], index: 7, kind: input, shape index: {}]   ;;  %s993_s8 = inlined_call_operand.hbm [shape: f32[2,1], index: 8, kind: input, shape index: {}]   ;;  %s994_s9 = inlined_call_operand.hbm [shape: bf16[2,128], index: 9, kind: output, shape index: {}]  }
   0x1   :  { %15 = vsyncpa [#allocation6], 0 }
   0x2   :  { %16 = vsyncpa [#allocation9], 0 }
   0x3   :  { %17 = vsyncpa [#allocation12], 0 }
   0x4   :  { %18 = vsyncpa [#allocation15], 0 }
   0x5   :  { %19 = vsyncpa [#allocation4], 0  ;;  %s760_s30 = smov [#allocation5]   ;;  %s528_s13 = scalar_lea.hbm %s986_s1, 128 }
   0x6   :  { %s35_s10 = sshll.u32 %s760_s30, 4  ;;  %p529_p0 = scmp.ne.s32.totalorder %s986_s1, %s528_s13  ;;  %s36_s10 = int_to_ptr.vmem [resolvable:$true] %s35_s10 }
   0x7   :  { %p532_p1 = scmp.lt.u32.totalorder %s528_s13, %s986_s1 }
   0x9   :  { %p534_p2 = pnand %p532_p1, %p529_p0 }
   0xb   :  { %537 = shalt.err (!%p534_p2)
}
   0xc   :  { %s538_s18 = scalar_lea.vmem %s36_s10, 128  ;;  %p543_p4 = scmp.lt.s32.totalorder %s36_s10, %s36_s10 }
   0xd   :  { %p539_p3 = scmp.ne.s32.totalorder %s36_s10, %s538_s18  ;;  %p544_p5 = scmp.lt.s32.totalorder %s538_s18, %s538_s18 }
   0xf   :  { %p545_p6 = por %p544_p5, %p543_p4 }
  0x11   :  { %p546_p7 = pnand %p545_p6, %p539_p3 }
  0x13   :  { %549 = shalt.err (!%p546_p7)
}
  0x14   :  { %s761_s19 = smov 64   ;;  %s762_s20 = smov 4  }
  0x15   :  { %41 = dma.hbm_to_vmem [thread:$0]  %s986_s1, 128, %s36_s10, [#allocation6], %s761_s19, %s761_s19, %s762_s20  }
  0x16   :  { %s763_s23 = smov [#allocation8]   ;;  %s764_s25 = smov [#allocation11]  }
  0x17   :  { %s59_s24 = sshll.u32 %s763_s23, 4  ;;  %s83_s26 = sshll.u32 %s764_s25, 4  ;;  %s60_s24 = int_to_ptr.vmem [resolvable:$true] %s59_s24  ;;  %s84_s26 = int_to_ptr.vmem [resolvable:$true] %s83_s26 }
  0x18   :  { %s550_s29 = scalar_lea.hbm %s988_s3, 256 }
  0x19   :  { %p551_p8 = scmp.ne.s32.totalorder %s988_s3, %s550_s29  ;;  %p554_p9 = scmp.lt.u32.totalorder %s550_s29, %s988_s3 }
  0x1b   :  { %p556_p10 = pnand %p554_p9, %p551_p8 }
  0x1d   :  { %559 = shalt.err (!%p556_p10)
}
  0x1e   :  { %s560_s1 = scalar_lea.vmem %s60_s24, 256  ;;  %p565_p12 = scmp.lt.s32.totalorder %s60_s24, %s60_s24 }
  0x1f   :  { %p561_p11 = scmp.ne.s32.totalorder %s60_s24, %s560_s1  ;;  %p566_p13 = scmp.lt.s32.totalorder %s560_s1, %s560_s1 }
  0x21   :  { %p567_p0 = por %p566_p13, %p565_p12 }
  0x23   :  { %p568_p1 = pnand %p567_p0, %p561_p11 }
  0x25   :  { %571 = shalt.err (!%p568_p1)
}
  0x26   :  { %65 = dma.hbm_to_vmem [thread:$0]  %s988_s3, 256, %s60_s24, [#allocation9], %s761_s19, %s761_s19, %s762_s20  }
  0x27   :  { %s572_s17 = scalar_lea.hbm %s990_s5, 128 }
  0x28   :  { %p573_p2 = scmp.ne.s32.totalorder %s990_s5, %s572_s17  ;;  %p576_p3 = scmp.lt.u32.totalorder %s572_s17, %s990_s5 }
  0x2a   :  { %p578_p4 = pnand %p576_p3, %p573_p2 }
  0x2c   :  { %581 = shalt.err (!%p578_p4)
}
  0x2d   :  { %s582_s25 = scalar_lea.vmem %s84_s26, 128  ;;  %p587_p6 = scmp.lt.s32.totalorder %s84_s26, %s84_s26 }
  0x2e   :  { %p583_p5 = scmp.ne.s32.totalorder %s84_s26, %s582_s25  ;;  %p588_p7 = scmp.lt.s32.totalorder %s582_s25, %s582_s25 }
  0x30   :  { %p589_p8 = por %p588_p7, %p587_p6 }
  0x32   :  { %p590_p9 = pnand %p589_p8, %p583_p5 }
  0x34   :  { %593 = shalt.err (!%p590_p9)
}
  0x35   :  { %89 = dma.hbm_to_vmem [thread:$0]  %s990_s5, 128, %s84_s26, [#allocation12], %s761_s19, %s761_s19, %s762_s20  }
  0x36   :  { %s765_s27 = smov [#allocation14]   ;;  %s766_s29 = smov [#allocation2]  }
  0x37   :  { %s108_s28 = sshll.u32 %s765_s27, 4  ;;  %s26_s30 = sshll.u32 %s766_s29, 4  ;;  %s109_s28 = int_to_ptr.vmem [resolvable:$true] %s108_s28  ;;  %s27_s30 = int_to_ptr.vmem [resolvable:$true] %s26_s30 }
  0x38   :  { %s594_s13 = scalar_lea.hbm %s992_s7, 16 }
  0x39   :  { %p595_p10 = scmp.ne.s32.totalorder %s992_s7, %s594_s13  ;;  %p598_p11 = scmp.lt.u32.totalorder %s594_s13, %s992_s7 }
  0x3b   :  { %p600_p12 = pnand %p598_p11, %p595_p10 }
  0x3d   :  { %603 = shalt.err (!%p600_p12)
}
  0x3e   :  { %s604_s5 = scalar_lea.vmem %s109_s28, 16  ;;  %s608_s19 = scalar_lea.vmem %s109_s28, 32 }
  0x3f   :  { %p605_p13 = scmp.ne.s32.totalorder %s109_s28, %s604_s5  ;;  %p609_p0 = scmp.lt.s32.totalorder %s109_s28, %s109_s28 }
  0x40   :  { %p610_p1 = scmp.lt.s32.totalorder %s608_s19, %s604_s5 }
  0x42   :  { %p611_p2 = por %p610_p1, %p609_p0 }
  0x44   :  { %p612_p3 = pnand %p611_p2, %p605_p13 }
  0x46   :  { %615 = shalt.err (!%p612_p3)
}
  0x47   :  { %111 = dma.hbm_to_vmem [thread:$0]  %s992_s7, 16, %s109_s28, [#allocation15]  }
  0x48   :  { %s616_s18 = scalar_lea.hbm %s985_s0, 32 }
  0x49   :  { %p617_p4 = scmp.ne.s32.totalorder %s985_s0, %s616_s18  ;;  %p620_p5 = scmp.lt.u32.totalorder %s616_s18, %s985_s0 }
  0x4b   :  { %p622_p6 = pnand %p620_p5, %p617_p4 }
  0x4d   :  { %625 = shalt.err (!%p622_p6)
}
  0x4e   :  { %s626_s3 = scalar_lea.vmem %s27_s30, 32  ;;  %p631_p8 = scmp.lt.s32.totalorder %s27_s30, %s27_s30 }
  0x4f   :  { %p627_p7 = scmp.ne.s32.totalorder %s27_s30, %s626_s3  ;;  %p632_p9 = scmp.lt.s32.totalorder %s626_s3, %s626_s3 }
  0x51   :  { %p633_p10 = por %p632_p9, %p631_p8 }
  0x53   :  { %p634_p11 = pnand %p633_p10, %p627_p7 }
  0x55   :  { %637 = shalt.err (!%p634_p11)
}
  0x56   :  { %29 = dma.hbm_to_vmem [thread:$0]  %s985_s0, 32, %s27_s30, [#allocation3]  }
  0x57   :  { %s767_s27 = smov [#allocation7]   ;;  %s638_s12 = scalar_lea.hbm %s987_s2, 256 }
  0x58   :  { %s47_s28 = sshll.u32 %s767_s27, 4  ;;  %p639_p12 = scmp.ne.s32.totalorder %s987_s2, %s638_s12  ;;  %s48_s28 = int_to_ptr.vmem [resolvable:$true] %s47_s28 }
  0x59   :  { %p642_p13 = scmp.lt.u32.totalorder %s638_s12, %s987_s2 }
  0x5b   :  { %p644_p0 = pnand %p642_p13, %p639_p12 }
  0x5d   :  { %647 = shalt.err (!%p644_p0)
}
  0x5e   :  { %s648_s15 = scalar_lea.vmem %s48_s28, 256  ;;  %p653_p2 = scmp.lt.s32.totalorder %s48_s28, %s48_s28 }
  0x5f   :  { %p649_p1 = scmp.ne.s32.totalorder %s48_s28, %s648_s15  ;;  %p654_p3 = scmp.lt.s32.totalorder %s648_s15, %s648_s15 }
  0x61   :  { %p655_p4 = por %p654_p3, %p653_p2 }
  0x63   :  { %p656_p5 = pnand %p655_p4, %p649_p1 }
  0x65   :  { %659 = shalt.err (!%p656_p5)
}
  0x66   :  { %s768_s0 = smov 128   ;;  %s769_s30 = smov 8  }
  0x67   :  { %53 = dma.hbm_to_vmem [thread:$0]  %s987_s2, 256, %s48_s28, [#allocation6], %s768_s0, %s768_s0, %s769_s30  }
  0x68   :  { %s770_s20 = smov [#allocation10]   ;;  %s771_s16 = smov [#allocation13]  }
  0x69   :  { %s71_s26 = sshll.u32 %s770_s20, 4  ;;  %s95_s17 = sshll.u32 %s771_s16, 4  ;;  %s72_s26 = int_to_ptr.vmem [resolvable:$true] %s71_s26  ;;  %s911_s17 = int_to_ptr.vmem [resolvable:$true] %s95_s17 }
  0x6a   :  { %s660_s22 = scalar_lea.hbm %s989_s4, 512 }
  0x6b   :  { %p661_p6 = scmp.ne.s32.totalorder %s989_s4, %s660_s22  ;;  %p664_p7 = scmp.lt.u32.totalorder %s660_s22, %s989_s4 }
  0x6d   :  { %p666_p8 = pnand %p664_p7, %p661_p6 }
  0x6f   :  { %669 = shalt.err (!%p666_p8)
}
  0x70   :  { %s670_s2 = scalar_lea.vmem %s72_s26, 512  ;;  %p675_p10 = scmp.lt.s32.totalorder %s72_s26, %s72_s26 }
  0x71   :  { %p671_p9 = scmp.ne.s32.totalorder %s72_s26, %s670_s2  ;;  %p676_p11 = scmp.lt.s32.totalorder %s670_s2, %s670_s2 }
  0x73   :  { %p677_p12 = por %p676_p11, %p675_p10 }
  0x75   :  { %p678_p13 = pnand %p677_p12, %p671_p9 }
  0x77   :  { %681 = shalt.err (!%p678_p13)
}
  0x78   :  { %77 = dma.hbm_to_vmem [thread:$0]  %s989_s4, 512, %s72_s26, [#allocation9], %s768_s0, %s768_s0, %s769_s30  }
  0x79   :  { %s682_s11 = scalar_lea.hbm %s991_s6, 256 }
  0x7a   :  { %p683_p0 = scmp.ne.s32.totalorder %s991_s6, %s682_s11  ;;  %p686_p1 = scmp.lt.u32.totalorder %s682_s11, %s991_s6 }
  0x7c   :  { %p688_p2 = pnand %p686_p1, %p683_p0 }
  0x7e   :  { %691 = shalt.err (!%p688_p2)
}
  0x7f   :  { %s692_s14 = scalar_lea.vmem %s911_s17, 256  ;;  %p697_p4 = scmp.lt.s32.totalorder %s911_s17, %s911_s17 }
  0x80   :  { %p693_p3 = scmp.ne.s32.totalorder %s911_s17, %s692_s14  ;;  %p698_p5 = scmp.lt.s32.totalorder %s692_s14, %s692_s14 }
  0x82   :  { %p699_p6 = por %p698_p5, %p697_p4 }
  0x84   :  { %p700_p7 = pnand %p699_p6, %p693_p3 }
  0x86   :  { %703 = shalt.err (!%p700_p7)
}
  0x87   :  { %101 = dma.hbm_to_vmem [thread:$0]  %s991_s6, 256, %s911_s17, [#allocation12], %s768_s0, %s768_s0, %s769_s30  }
  0x88   :  { %s772_s5 = smov [#allocation16]   ;;  %s704_s16 = scalar_lea.hbm %s993_s8, 32 }
  0x89   :  { %s118_s19 = sshll.u32 %s772_s5, 4  ;;  %p705_p8 = scmp.ne.s32.totalorder %s993_s8, %s704_s16  ;;  %s119_s19 = int_to_ptr.vmem [resolvable:$true] %s118_s19 }
  0x8a   :  { %p708_p9 = scmp.lt.u32.totalorder %s704_s16, %s993_s8 }
  0x8c   :  { %p710_p10 = pnand %p708_p9, %p705_p8 }
  0x8e   :  { %713 = shalt.err (!%p710_p10)
}
  0x8f   :  { %s714_s25 = scalar_lea.vmem %s119_s19, 32  ;;  %p719_p12 = scmp.lt.s32.totalorder %s119_s19, %s119_s19 }
  0x90   :  { %p715_p11 = scmp.ne.s32.totalorder %s119_s19, %s714_s25  ;;  %p720_p13 = scmp.lt.s32.totalorder %s714_s25, %s714_s25 }
  0x92   :  { %p721_p0 = por %p720_p13, %p719_p12 }
  0x94   :  { %p722_p1 = pnand %p721_p0, %p715_p11 }
  0x96   :  { %725 = shalt.err (!%p722_p1)
}
  0x97   :  { %121 = dma.hbm_to_vmem [thread:$0]  %s993_s8, 32, %s119_s19, [#allocation15]  }
  0x98   :  { %748 = dma.done.wait [#allocation3], 32  }
  0x99   :  { %749 = vsyncadd [#allocation3], 4294967264 }
  0x9a   :  { %750 = dma.done.wait [#allocation6], 384  }
  0x9b   :  { %751 = vsyncadd [#allocation6], 4294966912 }
  0x9c   :  { %752 = dma.done.wait [#allocation9], 768  }
  0x9d   :  { %753 = vsyncadd [#allocation9], 4294966528 }
  0x9e   :  { %754 = dma.done.wait [#allocation12], 384  }
  0x9f   :  { %755 = vsyncadd [#allocation12], 4294966912 }
  0xa0   :  { %756 = dma.done.wait [#allocation15], 48  }
  0xa1   :  { %757 = vsyncadd [#allocation15], 4294967248  ;;  %v773_v0 = vmov 0.0   ;;  %vm774_vm0 = vmmov 0   ;;  %v775_v1 = vmov 0   ;;  %vm174_vm1 = vcmask 1041408  }
  0xa2   :  { %479 = vmatprep.subr.bf16.mxu0 %v773_v0  ;;  %481 = vmatprep.mubr.msk.bf16.mxu0 %vm774_vm0, %v773_v0  ;;  %v150_v2 = vld [vmem:[#allocation2] sm:$0x3]  ;;  %v524_v4 = vld [vmem:[#allocation5] sm:$0xff]   ;;  %v153_v5 = vld [vmem:[#allocation7] sm:$0xff]  ;;  %vm170_vm2 = vcmask 31744   ;;  %vm260_vm3 = vcmask 130048  }
  0xa3   :  { %522 = vset.pattern.permute.xlu0 %v775_v1  ;;  %523 = vset.pattern.permute.xlu1 %v775_v1  ;;  %v176_v3 = vsel %vm174_vm1, %v150_v2, 0  ;;  %v154_v6 = vld [vmem:[#allocation7 + $0x8] sm:$0xff]  ;;  %v228_v7 = vld [vmem:[#allocation10 + $0x10] sm:$0xff]  ;;  %v390_v9 = vld [vmem:[#allocation16] sm:$0x3]  ;;  %vm341_vm4 = vcmask 261120  }
  0xa4   :  { %480 = vmatpush3.bf16.msra.mxu0 %v176_v3  ;;  %157 = vperm.xlu0 %522, %v153_v5   ;;  %v324_v8 = vld [vmem:[#allocation13] sm:$0xff]  ;;  %v525_v10 = vld [vmem:[#allocation8] sm:$0xff]   ;;  %v226_v11 = vld [vmem:[#allocation10] sm:$0xff]  ;;  %s776_s8 = smov [#allocation17]  }
  0xa5   :  { %491 = vmatprep.subr.bf16.mxu0 %v773_v0  ;;  %487 = vmatprep.mubr.msk.bf16.mxu1 %vm260_vm3, %v525_v10  ;;  %v227_v12 = vld [vmem:[#allocation10 + $0x8] sm:$0xff]  ;;  %v229_v13 = vld [vmem:[#allocation10 + $0x18] sm:$0xff]  ;;  %v325_v14 = vld [vmem:[#allocation13 + $0x8] sm:$0xff]  ;;  %s447_s30 = sshll.u32 %s776_s8, 4  ;;  %s448_s30 = int_to_ptr.vmem [resolvable:$true] %s447_s30 }
  0xa6   :  { %232 = vperm.xlu1 %523, %v226_v11   ;;  %v526_v26 = vld [vmem:[#allocation8 + $0x8] sm:$0xff]   ;;  %v527_v45 = vld [vmem:[#allocation11] sm:$0xff]   ;;  %s726_s17 = scalar_lea.vmem %s448_s30, 16  ;;  %s730_s3 = scalar_lea.vmem %s448_s30, 32 }
  0xa7   :  { %482 = vmatmul.mubr.msk.bf16.vlgmr.msra.gmra.mrb[0].mxu0 %vm170_vm2, %v524_v4  ;;  %v389_v57 = vld [vmem:[#allocation14] sm:$0x1]  ;;  %p727_p2 = scmp.ne.s32.totalorder %s448_s30, %s726_s17  ;;  %p731_p3 = scmp.lt.s32.totalorder %s448_s30, %s448_s30 }
  0xa8   :  { %162 = vperm.xlu0 %522, %v154_v6   ;;  %495 = vmatprep.mubr.msk.bf16.mxu0 %vm774_vm0, %v773_v0  ;;  %p732_p4 = scmp.lt.s32.totalorder %s730_s3, %s726_s17 }
  0xaa   :  { %237 = vperm.xlu1 %523, %v227_v12   ;;  %p733_p5 = por %p732_p4, %p731_p3 }
  0xac   :  { %242 = vperm.xlu0 %522, %v228_v7   ;;  %p734_p6 = pnand %p733_p5, %p727_p2 }
  0xae   :  { %247 = vperm.xlu1 %523, %v229_v13  }
  0xb0   :  { %328 = vperm.xlu0 %522, %v324_v8  }
  0xb2   :  { %333 = vperm.xlu1 %523, %v325_v14  }
  0xb4   :  { %393 = vperm.xlu0 %522, %v390_v9  }
 0x123   :  { %v158_v15 = vpop.permute.xlu0 %157 }
 0x125   :  { %v233_v27 = vpop.permute.xlu1 %232 }
 0x127   :  { %v163_v19 = vpop.permute.xlu0 %162 }
 0x129   :  { %v238_v28 = vpop.permute.xlu1 %237 }
 0x12b   :  { %v243_v29 = vpop.permute.xlu0 %242 }
 0x12d   :  { %v248_v33 = vpop.permute.xlu1 %247 }
 0x12f   :  { %v329_v46 = vpop.permute.xlu0 %328 }
 0x131   :  { %v334_v50 = vpop.permute.xlu1 %333 }
 0x133   :  { %v394_v58 = vpop.permute.xlu0 %393 }
 0x17a   :  { %v212_v16 = vpop.f32.mrb[0].mxu0 }
 0x17b   :  { %v213_v17 = vadd.f32 %v212_v16, %v158_v15  ;;  %v483_v18 = vpop.f32.mrb[1].mxu0 }
 0x17c   :  { %v215_v20 = vpop.f32.mrb[2].mxu0 }
 0x17d   :  { %v216_v21 = vadd.f32 %v215_v20, %v163_v19  ;;  %v484_v22 = vpop.f32.mrb[3].mxu0  ;;  %v219_v23 = vmax.f32 %v213_v17, 0.0 }
 0x17f   :  { %v220_v24 = vmax.f32 %v216_v21, 0.0 }
 0x181   :  { %v221_v25 = vpack.c.bf16 %v220_v24, %v219_v23 }
 0x183   :  { %485 = vmatprep.subr.bf16.mxu1 %v221_v25 }
 0x184   :  { %486 = vmatpush3.bf16.msra.mxu1 %v221_v25 }
 0x185   :  { %499 = vmatprep.subr.bf16.mxu1 %v773_v0 }
 0x187   :  { %488 = vmatmul.mubr.msk.bf16.vlgmr.msra.gmra.mrb[0].mxu1 %vm260_vm3, %v526_v26 }
 0x188   :  { %501 = vmatprep.mubr.msk.bf16.mxu1 %vm774_vm0, %v773_v0 }
 0x25a   :  { %v489_v30 = vpop.f32.mrb[0].mxu1 }
 0x25b   :  { %v310_v31 = vadd.f32 %v489_v30, %v243_v29  ;;  %v301_v32 = vpop.f32.mrb[1].mxu1 }
 0x25c   :  { %v302_v34 = vadd.f32 %v301_v32, %v233_v27  ;;  %v490_v35 = vpop.f32.mrb[2].mxu1 }
 0x25d   :  { %v313_v36 = vadd.f32 %v490_v35, %v248_v33  ;;  %v304_v37 = vpop.f32.mrb[3].mxu1  ;;  %v318_v39 = vmax.f32 %v310_v31, 0.0 }
 0x25e   :  { %v305_v38 = vadd.f32 %v304_v37, %v238_v28  ;;  %v316_v41 = vmax.f32 %v302_v34, 0.0 }
 0x25f   :  { %v319_v40 = vmax.f32 %v313_v36, 0.0 }
 0x260   :  { %v317_v42 = vmax.f32 %v305_v38, 0.0 }
 0x261   :  { %v321_v43 = vpack.c.bf16 %v319_v40, %v318_v39 }
 0x262   :  { %v320_v44 = vpack.c.bf16 %v317_v42, %v316_v41 }
 0x264   :  { %492 = vmatpush3.bf16.msra.mxu0 %v320_v44 }
 0x265   :  { %493 = vmatprep.subr.bf16.mxu0 %v773_v0 }
 0x268   :  { %494 = vmatpush3.bf16.msra.mxu0 %v321_v43 }
 0x26b   :  { %496 = vmatmul.mubr.msk.bf16.vlgmr.msra.gmra.mrb[4].mxu0 %vm341_vm4, %v527_v45 }
 0x33e   :  { %v379_v47 = vpop.f32.mrb[4].mxu0 }
 0x33f   :  { %v380_v48 = vadd.f32 %v379_v47, %v329_v46  ;;  %v497_v49 = vpop.f32.mrb[5].mxu0 }
 0x340   :  { %v382_v51 = vpop.f32.mrb[6].mxu0 }
 0x341   :  { %v383_v52 = vadd.f32 %v382_v51, %v334_v50  ;;  %v498_v53 = vpop.f32.mrb[7].mxu0  ;;  %v386_v54 = vmax.f32 %v380_v48, 0.0 }
 0x343   :  { %v387_v55 = vmax.f32 %v383_v52, 0.0 }
 0x345   :  { %v388_v56 = vpack.c.bf16 %v387_v55, %v386_v54 }
 0x347   :  { %500 = vmatpush3.bf16.msra.mxu1 %v388_v56 }
 0x34a   :  { %502 = vmatmul.mubr.msk.bf16.vlgmr.msra.gmra.mrb[4].mxu1 %vm260_vm3, %v389_v57 }
 0x41d   :  { %v433_v59 = vpop.f32.mrb[4].mxu1 }
 0x41e   :  { %v434_v60 = vadd.f32 %v433_v59, %v394_v58  ;;  %v503_v61 = vpop.f32.mrb[5].mxu1 }
 0x41f   :  { %v436_v62 = vpop.f32.mrb[6].mxu1 }
 0x420   :  { %v439_v63 = vpack.c.bf16 %v434_v60, %v434_v60  ;;  %v504_v0 = vpop.f32.mrb[7].mxu1 }
 0x422   :  { %440 = vst [vmem:[#allocation17] sm:$0x1] %v439_v63 }
 0x423   :  { %737 = shalt.err (!%p734_p6)
}
 0x424   :  { %s738_s24 = scalar_lea.hbm %s994_s9, 16 }
 0x425   :  { %p739_p7 = scmp.ne.s32.totalorder %s994_s9, %s738_s24  ;;  %p742_p8 = scmp.lt.u32.totalorder %s738_s24, %s994_s9 }
 0x427   :  { %p744_p9 = pnand %p742_p8, %p739_p7 }
 0x429   :  { %747 = shalt.err (!%p744_p9)
}
 0x42a   :  { %450 = dma.vmem_to_hbm [thread:$0]  %s448_s30, 16, %s994_s9, [#allocation4]  }
 0x42b   :  { %758 = dma.done.wait [#allocation4], 16  }
 0x42c   :  { %759 = vsyncadd [#allocation4], 4294967280 }
 0x42d   :  { %454 = vsyncpa [#allocation3], 1 }
 0x42e   :  { %455 = vsyncpa [#allocation6], 1 }
 0x42f   :  { %456 = vsyncpa [#allocation9], 1 }
 0x430   :  { %457 = vsyncpa [#allocation12], 1 }
 0x431   :  { %458 = vsyncpa [#allocation15], 1 }
 0x432   :  { %459 = vsyncpa [#allocation4], 1 }

</bundles_post_ra>
